<compile_context>
chip_gen: v5e
topology: v5e:2x2
jax: 0.10.0
libtpu: 0.0.40
codegen_flags: <defaults>
</compile_context>

<pallas_src>
import functools

import jax
import jax.numpy as jnp
from jax.experimental import pallas as pl
from jax.experimental.pallas import tpu as pltpu


def _round_up(x, m):
    return ((x + m - 1) // m) * m


def _pad2(a, rows, cols):
    return jnp.pad(a, ((0, rows - a.shape[0]), (0, cols - a.shape[1])))


# ---------------------------------------------------------------------------
# Kernels
# ---------------------------------------------------------------------------
def _gnn_kernel_fused(a_ref, x_ref, w_ref, b_ref, r_ref, out_ref):
    """Collapsed-reduction variant: one full A row-slab per grid step.

    a_ref : (tm, n_col_pad)      bf16   A row slab for row tile i
    x_ref : (n_col_pad, f1_pad)  bf16   X, VMEM-resident (constant block index)
    w_ref : (f1_pad, f2_pad)     bf16   resident
    b_ref : (1, f2_pad)          f32    resident
    r_ref : (g_pad, tm)          bf16   sum-pooling one-hot slice for tile i
    out   : (1, g_pad, f2_pad)   f32    partial pooled output for tile i
    """
    ax = jnp.dot(a_ref[...], x_ref[...], preferred_element_type=jnp.float32)
    h = jnp.dot(ax.astype(jnp.bfloat16), w_ref[...],
                preferred_element_type=jnp.float32)
    h = jnp.maximum(h + b_ref[...], 0.0)
    # Padded phantom rows give h = relu(b) != 0; cancelled by zero columns of r.
    pooled = jnp.dot(r_ref[...], h.astype(jnp.bfloat16),
                     preferred_element_type=jnp.float32)
    out_ref[...] = pooled[None]


def _gnn_kernel_reduce(a_ref, x_ref, w_ref, b_ref, r_ref, out_ref, acc_ref, *, tk):
    """Large-N fallback: reduction over k slabs of each A row tile.

    a_ref : (tm, tk) bf16, x_ref : (n_col_pad, f1_pad) bf16 resident (sliced),
    acc_ref : (tm, f1_pad) f32 scratch carrying A @ X across k.
    """
    k = pl.program_id(1)

    @pl.when(k == 0)
    def _init():
        acc_ref[...] = jnp.zeros_like(acc_ref)

    start = pl.multiple_of(k * tk, tk)
    acc_ref[...] += jnp.dot(a_ref[...], x_ref[pl.ds(start, tk), :],
                            preferred_element_type=jnp.float32)

    @pl.when(k == pl.num_programs(1) - 1)
    def _finalize():
        h = jnp.dot(acc_ref[...].astype(jnp.bfloat16), w_ref[...],
                    preferred_element_type=jnp.float32)
        h = jnp.maximum(h + b_ref[...], 0.0)
        pooled = jnp.dot(r_ref[...], h.astype(jnp.bfloat16),
                         preferred_element_type=jnp.float32)
        out_ref[...] = pooled[None]


# ---------------------------------------------------------------------------
# Wrapper
# ---------------------------------------------------------------------------
def gnn_forward(adj, x, w, b, readout_onehot, *,
                vmem_budget_bytes=40 * 1024 * 1024):
    """Fused GNN layer + sum readout:  readout_onehot @ relu(A @ X @ W + b).

    `readout_onehot` is the (G, N) 0/1 sum-pooling matrix; mean scaling is
    applied by the caller on the tiny (G, f2) result (keeps bf16 exact).
    """
    n, f1 = x.shape
    f2 = w.shape[1]
    g = readout_onehot.shape[0]

    f1_pad = _round_up(f1, 128)
    f2_pad = _round_up(f2, 128)
    g_pad = _round_up(g, 8)
    n_col_pad = _round_up(n, 128)

    # VMEM-resident bytes regardless of row tiling (count double-buffered
    # copies conservatively): X, W, bias, output tile.
    resident = 2 * (n_col_pad * f1_pad * 2 + f1_pad * f2_pad * 2
                    + f2_pad * 4 + g_pad * f2_pad * 4)

    # Largest row tile whose double-buffered A slab + readout slice fits the
    # budget (same derivation stays valid under v7x's 64 MiB physical VMEM).
    tm = None
    for cand in (1024, 512, 256, 128):
        if cand > n_col_pad and cand != 128:
            continue
        step = 2 * (cand * n_col_pad * 2 + g_pad * cand * 2)
        if resident + step <= vmem_budget_bytes:
            tm = cand
            break

    if tm is not None:
        # ------------------- collapsed-k (fused) path -----------------------
        n_row_pad = _round_up(n, tm)
        num_i = n_row_pad // tm

        a_p = _pad2(adj, n_row_pad, n_col_pad).astype(jnp.bfloat16)
        x_p = _pad2(x, n_col_pad, f1_pad).astype(jnp.bfloat16)
        w_p = _pad2(w, f1_pad, f2_pad).astype(jnp.bfloat16)
        b_p = _pad2(b, 1, f2_pad).astype(jnp.float32)
        r_p = _pad2(readout_onehot, g_pad, n_row_pad).astype(jnp.bfloat16)

        out_parts = pl.pallas_call(
            _gnn_kernel_fused,
            out_shape=jax.ShapeDtypeStruct((num_i, g_pad, f2_pad), jnp.float32),
            grid=(num_i,),
            in_specs=[
                pl.BlockSpec((tm, n_col_pad), lambda i: (i, 0)),      # A slab
                pl.BlockSpec((n_col_pad, f1_pad), lambda i: (0, 0)),  # X resident
                pl.BlockSpec((f1_pad, f2_pad), lambda i: (0, 0)),     # W resident
                pl.BlockSpec((1, f2_pad), lambda i: (0, 0)),          # bias
                pl.BlockSpec((g_pad, tm), lambda i: (0, i)),          # readout slice
            ],
            out_specs=pl.BlockSpec((1, g_pad, f2_pad), lambda i: (i, 0, 0)),
            compiler_params=pltpu.CompilerParams(
                # TODO(synk): on v7x, pltpu.CORE_PARALLEL on this axis engages
                # the second TensorCore; kept "parallel" for portability.
                dimension_semantics=("parallel",),
                vmem_limit_bytes=48 * 1024 * 1024,
            ),
        )(a_p, x_p, w_p, b_p, r_p)
    else:
        # ------------------- large-N reduction fallback ---------------------
        tm = 256
        tk = 2048

        def _bytes(tk_):
            ncp = _round_up(n, tk_)
            return (2 * (tm * tk_ * 2 + g_pad * tm * 2)
                    + 2 * (ncp * f1_pad * 2 + f1_pad * f2_pad * 2
                           + f2_pad * 4 + g_pad * f2_pad * 4)
                    + tm * f1_pad * 4)

        while tk > 128 and _bytes(tk) > vmem_budget_bytes:
            tk //= 2
        # TODO(synk): if X itself no longer fits VMEM (N >> 100k), stream X
        # per-k instead of keeping it resident.
        n_col_pad_k = _round_up(n, tk)
        n_row_pad = _round_up(n, tm)
        num_i = n_row_pad // tm
        num_k = n_col_pad_k // tk

        a_p = _pad2(adj, n_row_pad, n_col_pad_k).astype(jnp.bfloat16)
        x_p = _pad2(x, n_col_pad_k, f1_pad).astype(jnp.bfloat16)
        w_p = _pad2(w, f1_pad, f2_pad).astype(jnp.bfloat16)
        b_p = _pad2(b, 1, f2_pad).astype(jnp.float32)
        r_p = _pad2(readout_onehot, g_pad, n_row_pad).astype(jnp.bfloat16)

        out_parts = pl.pallas_call(
            functools.partial(_gnn_kernel_reduce, tk=tk),
            out_shape=jax.ShapeDtypeStruct((num_i, g_pad, f2_pad), jnp.float32),
            grid=(num_i, num_k),
            in_specs=[
                pl.BlockSpec((tm, tk), lambda i, k: (i, k)),               # A tile
                pl.BlockSpec((n_col_pad_k, f1_pad), lambda i, k: (0, 0)),  # X resident
                pl.BlockSpec((f1_pad, f2_pad), lambda i, k: (0, 0)),       # W resident
                pl.BlockSpec((1, f2_pad), lambda i, k: (0, 0)),            # bias
                pl.BlockSpec((g_pad, tm), lambda i, k: (0, i)),            # readout slice
            ],
            out_specs=pl.BlockSpec((1, g_pad, f2_pad), lambda i, k: (i, 0, 0)),
            scratch_shapes=[pltpu.VMEM((tm, f1_pad), jnp.float32)],
            compiler_params=pltpu.CompilerParams(
                dimension_semantics=("parallel", "arbitrary"),
                vmem_limit_bytes=48 * 1024 * 1024,
            ),
        )(a_p, x_p, w_p, b_p, r_p)

    # Sum the tiny per-row-tile pooled partials and strip the padding.
    return out_parts.sum(axis=0)[:g, :f2]


# ---------------------------------------------------------------------------
# Glue: parameter init (matches _reset_parameters) and graph preprocessing.
# ---------------------------------------------------------------------------
def xavier_uniform_relu(key, shape):
    """nn.init.xavier_uniform_ with gain = calculate_gain('relu') = sqrt(2)."""
    fan_in, fan_out = shape
    gain = jnp.sqrt(2.0)
    bound = gain * jnp.sqrt(6.0 / (fan_in + fan_out))
    return jax.random.uniform(key, shape, jnp.float32, -bound, bound)


def build_adjacency(edge_index, num_nodes):
    """Dense adjacency (sum aggregation) from [2, E] edge_index."""
    src, dst = edge_index[0], edge_index[1]
    adj = jnp.zeros((num_nodes, num_nodes), jnp.float32)
    adj = adj.at[dst, src].add(1.0)  # row = receiver, col = sender
    return adj


def build_readout_onehot(batch, num_graphs):
    """[G, N] 0/1 sum-pooling matrix (exact in bf16)."""
    return (batch[None, :] == jnp.arange(num_graphs)[:, None]).astype(jnp.float32)


if __name__ == "__main__":
    # Small, deterministic example consistent with Abstract_GNN(num_nodes, f1, f2, readout)
    num_nodes, f1, f2 = 8, 16, 32
    num_graphs = 2
    readout = "mean"

    key = jax.random.PRNGKey(0)
    k_x, k_w, k_b, k_e = jax.random.split(key, 4)

    # node features
    x = jax.random.normal(k_x, (num_nodes, f1), jnp.float32)

    # parameters, initialized per _reset_parameters
    w = xavier_uniform_relu(k_w, (f1, f2))
    b = jax.random.uniform(k_b, (1, f2), jnp.float32, -0.1, 0.1)

    # simple deterministic graph: ring edges + a few extra ones
    ring_src = jnp.arange(num_nodes)
    ring_dst = (ring_src + 1) % num_nodes
    extra_src = jax.random.randint(k_e, (6,), 0, num_nodes)
    extra_dst = (extra_src + 3) % num_nodes
    edge_index = jnp.stack(
        [jnp.concatenate([ring_src, extra_src]), jnp.concatenate([ring_dst, extra_dst])]
    )

    # batch vector: first half of nodes -> graph 0, second half -> graph 1
    batch = jnp.concatenate(
        [jnp.zeros(num_nodes // 2, jnp.int32), jnp.ones(num_nodes - num_nodes // 2, jnp.int32)]
    )

    adj = build_adjacency(edge_index, num_nodes)
    onehot = build_readout_onehot(batch, num_graphs)
    counts = jnp.maximum(onehot.sum(axis=1, keepdims=True), 1.0)

    pooled = gnn_forward(adj, x, w, b, onehot)
    out = pooled / counts if readout == "mean" else pooled
    out = jax.block_until_ready(out)

    # Pure-JAX reference of the same computation (same bf16-rounded MXU feeds).
    hp = jax.lax.Precision.HIGHEST
    ab = adj.astype(jnp.bfloat16).astype(jnp.float32)
    xb = x.astype(jnp.bfloat16).astype(jnp.float32)
    wb = w.astype(jnp.bfloat16).astype(jnp.float32)
    ax_ref = jnp.dot(ab, xb, precision=hp)
    axb = ax_ref.astype(jnp.bfloat16).astype(jnp.float32)
    h_ref = jnp.maximum(jnp.dot(axb, wb, precision=hp) + b, 0.0)
    hb = h_ref.astype(jnp.bfloat16).astype(jnp.float32)
    ref = jnp.dot(onehot, hb, precision=hp)
    if readout == "mean":
        ref = ref / counts

    assert out.shape == (num_graphs, f2)
    assert jnp.allclose(out, ref, atol=2e-3, rtol=2e-3), (
        f"max abs err = {jnp.max(jnp.abs(out - ref))}"
    )

    print("KERNEL_OK")
</pallas_src>

<mosaic_0001>
module attributes {stable_mosaic.version = 11 : i64} {
  func.func @_gnn_kernel_fused(%arg0: i32, %arg1: memref<128x128xbf16, #tpu.memory_space<vmem>>, %arg2: memref<128x128xbf16, #tpu.memory_space<vmem>>, %arg3: memref<128x128xbf16, #tpu.memory_space<vmem>>, %arg4: memref<1x128xf32, #tpu.memory_space<vmem>>, %arg5: memref<8x128xbf16, #tpu.memory_space<vmem>>, %arg6: memref<1x8x128xf32, #tpu.memory_space<vmem>>) attributes {dimension_semantics = [#tpu.dimension_semantics<parallel>], iteration_bounds = array<i64: 1>, scalar_prefetch = 0 : i64, scratch_operands = 0 : i64, tpu.core_type = #tpu.core_type<tc>, window_params = [{transform_indices = @transform_0, window_bounds = array<i64: 128, 128>}, {pipeline_mode = #tpu.pipeline_mode<synchronous>, transform_indices = @transform_1, window_bounds = array<i64: 128, 128>}, {pipeline_mode = #tpu.pipeline_mode<synchronous>, transform_indices = @transform_2, window_bounds = array<i64: 128, 128>}, {pipeline_mode = #tpu.pipeline_mode<synchronous>, transform_indices = @transform_3, window_bounds = array<i64: 1, 128>}, {transform_indices = @transform_4, window_bounds = array<i64: 8, 128>}, {transform_indices = @transform_5, window_bounds = array<i64: 1, 8, 128>}]} {
    %c0 = arith.constant 0 : index
    %c0_0 = arith.constant 0 : index
    %0 = vector.load %arg1[%c0, %c0_0] : memref<128x128xbf16, #tpu.memory_space<vmem>>, vector<128x128xbf16>
    %c0_1 = arith.constant 0 : index
    %c0_2 = arith.constant 0 : index
    %1 = vector.load %arg2[%c0_1, %c0_2] : memref<128x128xbf16, #tpu.memory_space<vmem>>, vector<128x128xbf16>
    %cst = arith.constant dense<0.000000e+00> : vector<128x128xf32>
    %2 = tpu.matmul %0, %1, %cst {dimension_numbers = #tpu.dot_dimension_numbers<[1], [0], [0], [1], [0, 0, 1, 1], [], []>} : vector<128x128xbf16>, vector<128x128xbf16>, vector<128x128xf32> -> vector<128x128xf32>
    %3 = arith.truncf %2 : vector<128x128xf32> to vector<128x128xbf16>
    %c0_3 = arith.constant 0 : index
    %c0_4 = arith.constant 0 : index
    %4 = vector.load %arg3[%c0_3, %c0_4] : memref<128x128xbf16, #tpu.memory_space<vmem>>, vector<128x128xbf16>
    %cst_5 = arith.constant dense<0.000000e+00> : vector<128x128xf32>
    %5 = tpu.matmul %3, %4, %cst_5 {dimension_numbers = #tpu.dot_dimension_numbers<[1], [0], [0], [1], [0, 0, 1, 1], [], []>} : vector<128x128xbf16>, vector<128x128xbf16>, vector<128x128xf32> -> vector<128x128xf32>
    %c0_6 = arith.constant 0 : index
    %c0_7 = arith.constant 0 : index
    %6 = vector.load %arg4[%c0_6, %c0_7] : memref<1x128xf32, #tpu.memory_space<vmem>>, vector<1x128xf32>
    %7 = vector.broadcast %6 : vector<1x128xf32> to vector<128x128xf32>
    %8 = arith.addf %5, %7 : vector<128x128xf32>
    %cst_8 = arith.constant 0.000000e+00 : f32
    %9 = vector.broadcast %cst_8 : f32 to vector<128x128xf32>
    %10 = arith.maximumf %8, %9 : vector<128x128xf32>
    %c0_9 = arith.constant 0 : index
    %c0_10 = arith.constant 0 : index
    %11 = vector.load %arg5[%c0_9, %c0_10] : memref<8x128xbf16, #tpu.memory_space<vmem>>, vector<8x128xbf16>
    %12 = arith.truncf %10 : vector<128x128xf32> to vector<128x128xbf16>
    %cst_11 = arith.constant dense<0.000000e+00> : vector<8x128xf32>
    %13 = tpu.matmul %11, %12, %cst_11 {dimension_numbers = #tpu.dot_dimension_numbers<[1], [0], [0], [1], [0, 0, 1, 1], [], []>} : vector<8x128xbf16>, vector<128x128xbf16>, vector<8x128xf32> -> vector<8x128xf32>
    %14 = vector.shape_cast %13 : vector<8x128xf32> to vector<1x8x128xf32>
    %c0_12 = arith.constant 0 : index
    %c0_13 = arith.constant 0 : index
    %c0_14 = arith.constant 0 : index
    %15 = vector.load %arg6[%c0_12, %c0_13, %c0_14] : memref<1x8x128xf32, #tpu.memory_space<vmem>>, vector<1x8x128xf32>
    tpu.vector_store %arg6[%c0_12, %c0_13, %c0_14], %14 {strides = array<i32>} : memref<1x8x128xf32, #tpu.memory_space<vmem>>, vector<1x8x128xf32>,
    return
  }
  func.func @transform_0(%arg0: i32) -> (i32, i32) {
    %c0_i32 = arith.constant 0 : i32
    %c0_i32_0 = arith.constant 0 : i32
    return %arg0, %c0_i32 : i32, i32
  }
  func.func @transform_1(%arg0: i32) -> (i32, i32) {
    %c0_i32 = arith.constant 0 : i32
    %c0_i32_0 = arith.constant 0 : i32
    %c0_i32_1 = arith.constant 0 : i32
    return %c0_i32, %c0_i32_0 : i32, i32
  }
  func.func @transform_2(%arg0: i32) -> (i32, i32) {
    %c0_i32 = arith.constant 0 : i32
    %c0_i32_0 = arith.constant 0 : i32
    %c0_i32_1 = arith.constant 0 : i32
    return %c0_i32, %c0_i32_0 : i32, i32
  }
  func.func @transform_3(%arg0: i32) -> (i32, i32) {
    %c0_i32 = arith.constant 0 : i32
    %c0_i32_0 = arith.constant 0 : i32
    %c0_i32_1 = arith.constant 0 : i32
    return %c0_i32, %c0_i32_0 : i32, i32
  }
  func.func @transform_4(%arg0: i32) -> (i32, i32) {
    %c0_i32 = arith.constant 0 : i32
    %c0_i32_0 = arith.constant 0 : i32
    return %c0_i32, %arg0 : i32, i32
  }
  func.func @transform_5(%arg0: i32) -> (i32, i32, i32) {
    %c0_i32 = arith.constant 0 : i32
    %c0_i32_0 = arith.constant 0 : i32
    %c0_i32_1 = arith.constant 0 : i32
    return %arg0, %c0_i32, %c0_i32_0 : i32, i32, i32
  }
}

</mosaic_0001>

<bundles_post_ra>
// kernel: tpu_custom_call.1
= control target key start
LH: loop header
LB: loop body
LE: loop exit
PB: predicated region body
PF: predicated region fallthrough
CT: control target
= control target key end

     0   :  { %10 = vsyncpa [#allocation3], 0  ;;  %s769_s0 = inlined_call_operand.hbm [shape: bf16[128,128], index: 0, kind: input, shape index: {}]   ;;  %s770_s1 = inlined_call_operand.hbm [shape: bf16[128,128], index: 1, kind: input, shape index: {}]   ;;  %s771_s2 = inlined_call_operand.hbm [shape: bf16[128,128], index: 2, kind: input, shape index: {}]   ;;  %s772_s3 = inlined_call_operand.vmem [shape: f32[1,128], index: 3, kind: input, shape index: {}]   ;;  %s773_s4 = inlined_call_operand.hbm [shape: bf16[8,128], index: 4, kind: input, shape index: {}]   ;;  %s774_s5 = inlined_call_operand.hbm [shape: f32[1,8,128], index: 5, kind: output, shape index: {}]  }
   0x1   :  { %11 = vsyncpa [#allocation6], 0 }
   0x2   :  { %12 = vsyncpa [#allocation9], 0 }
   0x3   :  { %13 = vsyncpa [#allocation4], 0  ;;  %s31_s20 = sshll.u32 %s770_s1, 4  ;;  %s714_s21 = smov [#allocation5]   ;;  %s32_s20 = int_to_ptr.hbm [resolvable:$true] %s31_s20 }
   0x4   :  { %s33_s22 = sshll.u32 %s714_s21, 4  ;;  %s18_s25 = sshll.u32 %s769_s0, 4  ;;  %s34_s22 = int_to_ptr.vmem [resolvable:$true] %s33_s22  ;;  %s19_s25 = int_to_ptr.hbm [resolvable:$true] %s18_s25 }
   0x5   :  { %s715_s26 = smov 64   ;;  %s716_s27 = smov 4  }
   0x6   :  { %39 = dma.hbm_to_vmem [thread:$0]  %s32_s20, 1024, %s34_s22, [#allocation6], %s715_s26, %s715_s26, %s716_s27  }
   0x7   :  { %s717_s28 = smov [#allocation2]   ;;  %s44_s7 = sshll.u32 %s771_s2, 4  ;;  %s45_s7 = int_to_ptr.hbm [resolvable:$true] %s44_s7 }
   0x8   :  { %s20_s29 = sshll.u32 %s717_s28, 4  ;;  %s60_s9 = sshll.u32 %s773_s4, 4  ;;  %s21_s29 = int_to_ptr.vmem [resolvable:$true] %s20_s29  ;;  %s61_s9 = int_to_ptr.hbm [resolvable:$true] %s60_s9 }
   0x9   :  { %26 = dma.hbm_to_vmem [thread:$0]  %s19_s25, 1024, %s21_s29, [#allocation3], %s715_s26, %s715_s26, %s716_s27  }
   0xa   :  { %s718_s10 = smov [#allocation7]   ;;  %s719_s0 = smov [#allocation8]  }
   0xb   :  { %s46_s11 = sshll.u32 %s718_s10, 4  ;;  %s62_s12 = sshll.u32 %s719_s0, 4  ;;  %s47_s11 = int_to_ptr.vmem [resolvable:$true] %s46_s11  ;;  %s63_s12 = int_to_ptr.vmem [resolvable:$true] %s62_s12 }
   0xc   :  { %52 = dma.hbm_to_vmem [thread:$0]  %s45_s7, 1024, %s47_s11, [#allocation6], %s715_s26, %s715_s26, %s716_s27  }
   0xd   :  { %65 = dma.hbm_to_vmem [thread:$0]  %s61_s9, 64, %s63_s12, [#allocation9]  }
   0xe   :  { %706 = dma.done.wait [#allocation3], 1024  }
   0xf   :  { %707 = vsyncadd [#allocation3], 4294966272 }
  0x10   :  { %708 = dma.done.wait [#allocation6], 2048  }
  0x11   :  { %709 = vsyncadd [#allocation6], 4294965248 }
  0x12   :  { %710 = dma.done.wait [#allocation9], 64  }
  0x13   :  { %711 = vsyncadd [#allocation9], 4294967232  ;;  %v553_v0 = vld [vmem:[#allocation5 + $0x38] sm:$0xff]  ;;  %v552_v1 = vld [vmem:[#allocation5 + $0x30] sm:$0xff]  ;;  %s430_s16 = sshll.u32 %s774_s5, 4  ;;  %s431_s16 = int_to_ptr.hbm [resolvable:$true] %s430_s16 }
  0x14   :  { %210 = vmatpush.bf16.msra.mxu0 %v553_v0  ;;  %562 = vmatpush.bf16.msra.mxu3 %v553_v0  ;;  %v551_v2 = vld [vmem:[#allocation5 + $0x28] sm:$0xff]  ;;  %v550_v3 = vld [vmem:[#allocation5 + $0x20] sm:$0xff]  ;;  %v549_v4 = vld [vmem:[#allocation5 + $0x18] sm:$0xff] }
  0x15   :  { %v548_v5 = vld [vmem:[#allocation5 + $0x10] sm:$0xff]  ;;  %v547_v6 = vld [vmem:[#allocation5 + $0x8] sm:$0xff]  ;;  %v546_v7 = vld [vmem:[#allocation5] sm:$0xff] }
  0x16   :  { %v538_v8 = vld [vmem:[#allocation2] sm:$0xff]  ;;  %v543_v9 = vld [vmem:[#allocation2 + $0x28] sm:$0xff]  ;;  %v544_v11 = vld [vmem:[#allocation2 + $0x30] sm:$0xff] }
  0x17   :  { %v539_v10 = vld [vmem:[#allocation2 + $0x8] sm:$0xff]  ;;  %v540_v12 = vld [vmem:[#allocation2 + $0x10] sm:$0xff]  ;;  %v545_v13 = vld [vmem:[#allocation2 + $0x38] sm:$0xff] }
  0x18   :  { %211 = vmatpush.bf16.msra.mxu0 %v552_v1  ;;  %563 = vmatpush.bf16.msra.mxu3 %v552_v1  ;;  %v561_v14 = vld [vmem:[#allocation7 + $0x38] sm:$0xff]  ;;  %v560_v15 = vld [vmem:[#allocation7 + $0x30] sm:$0xff]  ;;  %v559_v16 = vld [vmem:[#allocation7 + $0x28] sm:$0xff] }
  0x19   :  { %335 = vmatpush.bf16.msra.mxu1 %v561_v14  ;;  %570 = vmatpush.bf16.msra.mxu2 %v561_v14  ;;  %v558_v17 = vld [vmem:[#allocation7 + $0x20] sm:$0xff]  ;;  %v541_v18 = vld [vmem:[#allocation2 + $0x18] sm:$0xff]  ;;  %v556_v21 = vld [vmem:[#allocation7 + $0x10] sm:$0xff] }
  0x1a   :  { %v557_v19 = vld [vmem:[#allocation7 + $0x18] sm:$0xff]  ;;  %v542_v20 = vld [vmem:[#allocation2 + $0x20] sm:$0xff]  ;;  %v555_v22 = vld [vmem:[#allocation7 + $0x8] sm:$0xff] }
  0x1b   :  { %v554_v23 = vld [vmem:[#allocation7] sm:$0xff] }
  0x1c   :  { %212 = vmatpush.bf16.msra.mxu0 %v551_v2  ;;  %564 = vmatpush.bf16.msra.mxu3 %v551_v2  ;;  %v585_v49 = vld [vmem:[%s772_s3] ss:$0 sm:$0xff]  ;;  %s720_s3 = smov [#allocation10]  }
  0x1d   :  { %336 = vmatpush.bf16.msra.mxu1 %v560_v15  ;;  %571 = vmatpush.bf16.msra.mxu2 %v560_v15  ;;  %s428_s13 = sshll.u32 %s720_s3, 4  ;;  %s429_s13 = int_to_ptr.vmem [resolvable:$true] %s428_s13 }
  0x20   :  { %213 = vmatpush.bf16.msra.mxu0 %v550_v3  ;;  %565 = vmatpush.bf16.msra.mxu3 %v550_v3 }
  0x21   :  { %337 = vmatpush.bf16.msra.mxu1 %v559_v16  ;;  %572 = vmatpush.bf16.msra.mxu2 %v559_v16 }
  0x24   :  { %214 = vmatpush.bf16.msra.mxu0 %v549_v4  ;;  %566 = vmatpush.bf16.msra.mxu3 %v549_v4 }
  0x25   :  { %338 = vmatpush.bf16.msra.mxu1 %v558_v17  ;;  %573 = vmatpush.bf16.msra.mxu2 %v558_v17 }
  0x28   :  { %215 = vmatpush.bf16.msra.mxu0 %v548_v5  ;;  %567 = vmatpush.bf16.msra.mxu3 %v548_v5 }
  0x29   :  { %339 = vmatpush.bf16.msra.mxu1 %v557_v19  ;;  %574 = vmatpush.bf16.msra.mxu2 %v557_v19 }
  0x2c   :  { %216 = vmatpush.bf16.msra.mxu0 %v547_v6  ;;  %568 = vmatpush.bf16.msra.mxu3 %v547_v6 }
  0x2d   :  { %340 = vmatpush.bf16.msra.mxu1 %v556_v21  ;;  %575 = vmatpush.bf16.msra.mxu2 %v556_v21 }
  0x30   :  { %217 = vmatpush.bf16.msra.mxu0 %v546_v7  ;;  %569 = vmatpush.bf16.msra.mxu3 %v546_v7 }
  0x31   :  { %341 = vmatpush.bf16.msra.mxu1 %v555_v22  ;;  %576 = vmatpush.bf16.msra.mxu2 %v555_v22 }
  0x33   :  { %218 = vmatmul.bf16.vlgmr.msra.gmra.mxu0 %v538_v8  ;;  %243 = vmatmul.bf16.vlgmr.msra.gmra.mxu3 %v543_v9 }
  0x35   :  { %342 = vmatpush.bf16.msra.mxu1 %v554_v23  ;;  %577 = vmatpush.bf16.msra.mxu2 %v554_v23 }
  0x43   :  { %223 = vmatmul.bf16.gmra.mxu0 %v539_v10  ;;  %248 = vmatmul.bf16.gmra.mxu3 %v544_v11 }
  0x53   :  { %228 = vmatmul.bf16.gmra.mxu0 %v540_v12  ;;  %253 = vmatmul.bf16.gmra.mxu3 %v545_v13 }
  0x63   :  { %233 = vmatmul.bf16.gmra.mxu0 %v541_v18 }
  0x73   :  { %238 = vmatmul.bf16.gmra.mxu0 %v542_v20 }
  0xb0   :  { %v219_v24 = vpop.f32.mrf.mxu0 }
  0xb6   :  { %v244_v25 = vpop.f32.mrf.mxu3 }
  0xb8   :  { %v221_v26 = vpop.f32.mrf.mxu0 }
  0xb9   :  { %v259_v27 = vpack.c.bf16 %v221_v26, %v219_v24 }
  0xbb   :  { %343 = vmatmul.bf16.vlgmr.msra.gmra.mxu1 %v259_v27 }
  0xbe   :  { %v246_v28 = vpop.f32.mrf.mxu3 }
  0xbf   :  { %v264_v29 = vpack.c.bf16 %v246_v28, %v244_v25 }
  0xc0   :  { %v224_v30 = vpop.f32.mrf.mxu0 }
  0xc1   :  { %368 = vmatmul.bf16.vlgmr.msra.gmra.mxu2 %v264_v29 }
  0xc6   :  { %v249_v31 = vpop.f32.mrf.mxu3 }
  0xc8   :  { %v226_v32 = vpop.f32.mrf.mxu0 }
  0xc9   :  { %v260_v33 = vpack.c.bf16 %v226_v32, %v224_v30 }
  0xcb   :  { %348 = vmatmul.bf16.gmra.mxu1 %v260_v33 }
  0xce   :  { %v251_v34 = vpop.f32.mrf.mxu3 }
  0xcf   :  { %v265_v35 = vpack.c.bf16 %v251_v34, %v249_v31 }
  0xd0   :  { %v229_v36 = vpop.f32.mrf.mxu0 }
  0xd1   :  { %373 = vmatmul.bf16.gmra.mxu2 %v265_v35 }
  0xd6   :  { %v254_v37 = vpop.f32.mrf.mxu3 }
  0xd8   :  { %v231_v38 = vpop.f32.mrf.mxu0 }
  0xd9   :  { %v261_v39 = vpack.c.bf16 %v231_v38, %v229_v36 }
  0xdb   :  { %353 = vmatmul.bf16.gmra.mxu1 %v261_v39 }
  0xde   :  { %v256_v40 = vpop.f32.mrf.mxu3 }
  0xdf   :  { %v266_v41 = vpack.c.bf16 %v256_v40, %v254_v37 }
  0xe0   :  { %v234_v42 = vpop.f32.mrf.mxu0 }
  0xe1   :  { %378 = vmatmul.bf16.gmra.mxu2 %v266_v41  ;;  %v400_v41 = vld [vmem:[#allocation8] sm:$0xf] }
  0xe8   :  { %v236_v43 = vpop.f32.mrf.mxu0 }
  0xe9   :  { %v262_v44 = vpack.c.bf16 %v236_v43, %v234_v42 }
  0xeb   :  { %358 = vmatmul.bf16.gmra.mxu1 %v262_v44 }
  0xf0   :  { %v239_v45 = vpop.f32.mrf.mxu0 }
  0xf8   :  { %v241_v46 = vpop.f32.mrf.mxu0 }
  0xf9   :  { %v263_v47 = vpack.c.bf16 %v241_v46, %v239_v45 }
  0xfb   :  { %363 = vmatmul.bf16.gmra.mxu1 %v263_v47 }
 0x138   :  { %v344_v48 = vpop.f32.mrf.mxu1 }
 0x139   :  { %v345_v50 = vadd.f32 %v585_v49, %v344_v48 }
 0x13b   :  { %v384_v53 = vmax.f32 %v345_v50, 0.0 }
 0x140   :  { %v346_v51 = vpop.f32.mrf.mxu1 }
 0x141   :  { %v347_v52 = vadd.f32 %v585_v49, %v346_v51 }
 0x143   :  { %v385_v54 = vmax.f32 %v347_v52, 0.0 }
 0x144   :  { %v369_v55 = vpop.f32.mrf.mxu2 }
 0x145   :  { %v401_v56 = vpack.c.bf16 %v385_v54, %v384_v53  ;;  %v370_v13 = vadd.f32 %v585_v49, %v369_v55 }
 0x147   :  { %v394_v17 = vmax.f32 %v370_v13, 0.0 }
 0x148   :  { %v349_v57 = vpop.f32.mrf.mxu1 }
 0x149   :  { %v350_v35 = vadd.f32 %v585_v49, %v349_v57 }
 0x14b   :  { %v386_v39 = vmax.f32 %v350_v35, 0.0 }
 0x14c   :  { %v371_v58 = vpop.f32.mrf.mxu2 }
 0x14d   :  { %v372_v10 = vadd.f32 %v585_v49, %v371_v58 }
 0x14f   :  { %v395_v15 = vmax.f32 %v372_v10, 0.0 }
 0x150   :  { %v351_v59 = vpop.f32.mrf.mxu1 }
 0x151   :  { %v406_v19 = vpack.c.bf16 %v395_v15, %v394_v17  ;;  %v352_v32 = vadd.f32 %v585_v49, %v351_v59 }
 0x153   :  { %v387_v37 = vmax.f32 %v352_v32, 0.0 }
 0x154   :  { %v374_v60 = vpop.f32.mrf.mxu2 }
 0x155   :  { %v375_v6 = vadd.f32 %v585_v49, %v374_v60  ;;  %v402_v40 = vpack.c.bf16 %v387_v37, %v386_v39 }
 0x157   :  { %v396_v14 = vmax.f32 %v375_v6, 0.0 }
 0x158   :  { %v354_v61 = vpop.f32.mrf.mxu1 }
 0x159   :  { %v355_v30 = vadd.f32 %v585_v49, %v354_v61 }
 0x15b   :  { %v388_v36 = vmax.f32 %v355_v30, 0.0 }
 0x15c   :  { %v376_v62 = vpop.f32.mrf.mxu2 }
 0x15d   :  { %v377_v4 = vadd.f32 %v585_v49, %v376_v62 }
 0x15f   :  { %v397_v11 = vmax.f32 %v377_v4, 0.0 }
 0x160   :  { %v356_v63 = vpop.f32.mrf.mxu1 }
 0x161   :  { %v407_v16 = vpack.c.bf16 %v397_v11, %v396_v14  ;;  %v357_v27 = vadd.f32 %v585_v49, %v356_v63 }
 0x163   :  { %v389_v33 = vmax.f32 %v357_v27, 0.0 }
 0x164   :  { %v379_v0 = vpop.f32.mrf.mxu2 }
 0x165   :  { %v380_v2 = vadd.f32 %v585_v49, %v379_v0  ;;  %v403_v38 = vpack.c.bf16 %v389_v33, %v388_v36 }
 0x167   :  { %v398_v7 = vmax.f32 %v380_v2, 0.0 }
 0x168   :  { %v359_v1 = vpop.f32.mrf.mxu1 }
 0x169   :  { %v360_v24 = vadd.f32 %v585_v49, %v359_v1 }
 0x16b   :  { %v390_v31 = vmax.f32 %v360_v24, 0.0 }
 0x16c   :  { %v381_v3 = vpop.f32.mrf.mxu2 }
 0x16d   :  { %v382_v5 = vadd.f32 %v585_v49, %v381_v3 }
 0x16f   :  { %v399_v8 = vmax.f32 %v382_v5, 0.0 }
 0x170   :  { %v361_v9 = vpop.f32.mrf.mxu1 }
 0x171   :  { %v408_v12 = vpack.c.bf16 %v399_v8, %v398_v7  ;;  %v362_v22 = vadd.f32 %v585_v49, %v361_v9 }
 0x173   :  { %409 = vmatpush.bf16.msrb.mxu2 %v408_v12  ;;  %v391_v28 = vmax.f32 %v362_v22, 0.0 }
 0x175   :  { %v404_v34 = vpack.c.bf16 %v391_v28, %v390_v31 }
 0x177   :  { %410 = vmatpush.bf16.msrb.mxu2 %v407_v16 }
 0x178   :  { %v364_v18 = vpop.f32.mrf.mxu1 }
 0x179   :  { %v365_v20 = vadd.f32 %v585_v49, %v364_v18 }
 0x17b   :  { %411 = vmatpush.bf16.msrb.mxu2 %v406_v19  ;;  %v392_v25 = vmax.f32 %v365_v20, 0.0 }
 0x180   :  { %v366_v21 = vpop.f32.mrf.mxu1 }
 0x181   :  { %v367_v23 = vadd.f32 %v585_v49, %v366_v21 }
 0x183   :  { %v393_v26 = vmax.f32 %v367_v23, 0.0 }
 0x185   :  { %v405_v29 = vpack.c.bf16 %v393_v26, %v392_v25 }
 0x187   :  { %412 = vmatpush.bf16.msrb.mxu2 %v405_v29 }
 0x18b   :  { %413 = vmatpush.bf16.msrb.mxu2 %v404_v34 }
 0x18f   :  { %414 = vmatpush.bf16.msrb.mxu2 %v403_v38 }
 0x193   :  { %415 = vmatpush.bf16.msrb.mxu2 %v402_v40 }
 0x197   :  { %416 = vmatpush.bf16.msrb.mxu2 %v401_v56 }
 0x19a   :  { %417 = vmatmul.bf16.vlgmr.msrb.gmra.mxu2 %v400_v41 }
 0x21d   :  { %v418_v42 = vpop.f32.mrf.mxu2 }
 0x21e   :  { %422 = vst [vmem:[#allocation10] sm:$0xff] %v418_v42 }
 0x21f   :  { %433 = dma.vmem_to_hbm [thread:$0]  %s429_s13, 128, %s431_s16, [#allocation4]  }
 0x225   :  { %v420_v43 = vpop.f32.mrf.mxu2 }
 0x226   :  { %712 = dma.done.wait [#allocation4], 128  }
 0x227   :  { %713 = vsyncadd [#allocation4], 4294967168 }
 0x228   :  { %438 = vsyncpa [#allocation3], 1 }
 0x229   :  { %439 = vsyncpa [#allocation6], 1 }
 0x22a   :  { %440 = vsyncpa [#allocation9], 1 }
 0x22b   :  { %441 = vsyncpa [#allocation4], 1 }

</bundles_post_ra>
